<compile_context>
chip_gen: v7x
topology: tpu7x:2x2x1
jax: 0.10.0
libtpu: 0.0.40
codegen_flags: <defaults>
</compile_context>

<pallas_src>
import functools

import jax
import jax.numpy as jnp
from jax.experimental import pallas as pl
from jax.experimental.pallas import tpu as pltpu


def _fusion_kernel_lane(f_ref, o_ref, *, view_num, C, acc_dtype, inv_n):
    # f_ref: (TILE, view_num*C)  -- each view is a lane-aligned C-wide slab.
    # o_ref: (TILE, C)
    acc = f_ref[:, 0:C].astype(acc_dtype)
    for v in range(1, view_num):
        lo = v * C
        acc = acc + f_ref[:, lo:lo + C].astype(acc_dtype)
    o_ref[...] = (acc * inv_n).astype(o_ref.dtype)


def _fusion_kernel_strided(f_ref, o_ref, *, view_num, acc_dtype, inv_n):
    # Fallback for C not a multiple of 128.
    # f_ref: (TILE*view_num, C); strided sublane loads pick view v of every group.
    tile = o_ref.shape[0]
    acc = f_ref[pl.ds(0, tile, stride=view_num), :].astype(acc_dtype)
    for v in range(1, view_num):
        acc = acc + f_ref[pl.ds(v, tile, stride=view_num), :].astype(acc_dtype)
    o_ref[...] = (acc * inv_n).astype(o_ref.dtype)


def _pick_tile(chunk, bytes_per_out_row, sub):
    """Output rows per grid step: ~8 MiB input block, multiple of `sub` rows."""
    target_in_bytes = 8 << 20
    tile = max(sub, (target_in_bytes // max(1, bytes_per_out_row) // sub) * sub)
    if tile < chunk:
        return int(tile)
    # Whole problem fits in one ~8 MiB block.  If it is big enough that a
    # second grid step would let v7x's second TensorCore help stream HBM,
    # split it into 2 parallel steps (per-step overhead is negligible here).
    if chunk >= 2 * sub and chunk * bytes_per_out_row > (2 << 20):
        half = -(-chunk // 2)            # ceil(chunk / 2)
        half = -(-half // sub) * sub     # round up to sublane multiple
        return int(min(half, chunk))
    return int(chunk)


def view_fusion(features, pids, view_num, *, tile=None):
    """Pallas equivalent of View_Fusion.forward.

    features: (B, C) array, B divisible by view_num (views contiguous per group)
    pids:     (B,)  int array
    returns (fused: (B//view_num, C), fused_pids: (B//view_num,))
    """
    B, C = features.shape
    assert B % view_num == 0, "batch must be divisible by view_num"
    chunk = B // view_num

    # Integer inputs: use float-mean semantics (avoid pre-scale overflow).
    if not jnp.issubdtype(features.dtype, jnp.floating):
        features = features.astype(jnp.float32)

    dtype = features.dtype
    itemsize = jnp.dtype(dtype).itemsize
    sub = max(8, (32 // itemsize) * 8)          # f32: 8, bf16: 16, int8/fp8: 32
    bytes_per_out_row = view_num * C * itemsize

    if tile is None:
        tile = _pick_tile(chunk, bytes_per_out_row, sub)
    tile = int(min(tile, chunk))
    grid = (pl.cdiv(chunk, tile),)

    acc_dtype = jnp.float32 if itemsize < 4 else dtype
    inv_n = 1.0 / view_num

    lane_path = (C % 128 == 0)
    if lane_path:
        # Free row-major view: (chunk, view_num*C); per-view slices are
        # lane-contiguous and 128-aligned -> dense unmasked vld.
        f_in = features.reshape(chunk, view_num * C)
        kernel = functools.partial(
            _fusion_kernel_lane, view_num=view_num, C=C,
            acc_dtype=acc_dtype, inv_n=inv_n)
        in_spec = pl.BlockSpec((tile, view_num * C), lambda i: (i, 0))
    else:
        f_in = features
        kernel = functools.partial(
            _fusion_kernel_strided, view_num=view_num,
            acc_dtype=acc_dtype, inv_n=inv_n)
        in_spec = pl.BlockSpec((tile * view_num, C), lambda i: (i, 0))

    in_block_bytes = tile * view_num * C * itemsize
    out_block_bytes = tile * C * itemsize
    # Double-buffered blocks + headroom; never claim all of v7x's 64 MiB VMEM.
    vmem_limit = int(min(48 << 20,
                         2 * (in_block_bytes + out_block_bytes) + (4 << 20)))

    fused = pl.pallas_call(
        kernel,
        out_shape=jax.ShapeDtypeStruct((chunk, C), dtype),
        grid=grid,
        in_specs=[in_spec],
        out_specs=pl.BlockSpec((tile, C), lambda i: (i, 0)),
        compiler_params=pltpu.CompilerParams(
            dimension_semantics=("parallel",),
            vmem_limit_bytes=vmem_limit,
        ),
        cost_estimate=pl.CostEstimate(
            flops=view_num * chunk * C,
            transcendentals=0,
            bytes_accessed=(B + chunk) * C * itemsize,
        ),
    )(f_in)

    # Glue: pid selection is a pure view/index op (no compute hot path).
    fused_pids = pids.reshape(chunk, view_num)[:, 0]
    return fused, fused_pids


def _reference(features, pids, view_num):
    B, C = features.shape
    chunk = B // view_num
    f = features
    if not jnp.issubdtype(f.dtype, jnp.floating):
        f = f.astype(jnp.float32)
    fused = f.reshape(chunk, view_num, C).astype(jnp.float32).mean(axis=1)
    return fused.astype(f.dtype), pids.reshape(chunk, view_num)[:, 0]


if __name__ == "__main__":
    key = jax.random.PRNGKey(0)
    k1, k2, k3, k4 = jax.random.split(key, 4)

    # --- test 1: small, lane-aligned path (C % 128 == 0), single grid step ---
    view_num = 4
    B, C = 8, 128
    feats = jax.random.normal(k1, (B, C), dtype=jnp.float32)
    pids = jnp.repeat(jnp.arange(B // view_num, dtype=jnp.int32), view_num)
    fused, fpids = view_fusion(feats, pids, view_num)
    fused = jax.block_until_ready(fused)
    rf, rp = _reference(feats, pids, view_num)
    assert jnp.allclose(fused, rf, atol=1e-5, rtol=1e-5)
    assert jnp.array_equal(fpids, rp)

    # --- test 2: strided fallback path (C not a multiple of 128) ---
    vn2, B2, C2 = 3, 9, 32
    feats2 = jax.random.normal(k2, (B2, C2), dtype=jnp.float32)
    pids2 = jnp.repeat(jnp.arange(B2 // vn2, dtype=jnp.int32), vn2)
    fused2, fpids2 = view_fusion(feats2, pids2, vn2)
    fused2 = jax.block_until_ready(fused2)
    rf2, rp2 = _reference(feats2, pids2, vn2)
    assert jnp.allclose(fused2, rf2, atol=1e-5, rtol=1e-5)
    assert jnp.array_equal(fpids2, rp2)

    # --- test 3: multi-step grid with a non-divisible last tile (chunk=40, tile=16) ---
    vn3, chunk3, C3 = 4, 40, 256
    B3 = vn3 * chunk3
    feats3 = jax.random.normal(k3, (B3, C3), dtype=jnp.float32)
    pids3 = jnp.repeat(jnp.arange(chunk3, dtype=jnp.int32), vn3)
    fused3, fpids3 = view_fusion(feats3, pids3, vn3, tile=16)
    fused3 = jax.block_until_ready(fused3)
    rf3, rp3 = _reference(feats3, pids3, vn3)
    assert jnp.allclose(fused3, rf3, atol=1e-5, rtol=1e-5)
    assert jnp.array_equal(fpids3, rp3)

    # --- test 4: bf16 input, f32 accumulation on the lane path ---
    vn4, chunk4, C4 = 4, 24, 256
    B4 = vn4 * chunk4
    feats4 = jax.random.normal(k4, (B4, C4), dtype=jnp.float32).astype(jnp.bfloat16)
    pids4 = jnp.repeat(jnp.arange(chunk4, dtype=jnp.int32), vn4)
    fused4, fpids4 = view_fusion(feats4, pids4, vn4)
    fused4 = jax.block_until_ready(fused4)
    rf4, rp4 = _reference(feats4, pids4, vn4)
    assert jnp.allclose(fused4.astype(jnp.float32), rf4.astype(jnp.float32),
                        atol=1e-2, rtol=1e-2)
    assert jnp.array_equal(fpids4, rp4)

    print("KERNEL_OK")
</pallas_src>

<mosaic_0001>
module attributes {stable_mosaic.version = 11 : i64} {
  func.func @_fusion_kernel_lane(%arg0: i32, %arg1: memref<2x512xf32, #tpu.memory_space<vmem>>, %arg2: memref<2x128xf32, #tpu.memory_space<vmem>>) attributes {dimension_semantics = [#tpu.dimension_semantics<parallel>], iteration_bounds = array<i64: 1>, scalar_prefetch = 0 : i64, scratch_operands = 0 : i64, tpu.core_type = #tpu.core_type<tc>, window_params = [{transform_indices = @transform_0, window_bounds = array<i64: 2, 512>}, {transform_indices = @transform_1, window_bounds = array<i64: 2, 128>}]} {
    %c0 = arith.constant 0 : index
    %c0_0 = arith.constant 0 : index
    %0 = vector.load %arg1[%c0, %c0_0] : memref<2x512xf32, #tpu.memory_space<vmem>>, vector<2x128xf32>
    %c0_1 = arith.constant 0 : index
    %c128 = arith.constant 128 : index
    %1 = vector.load %arg1[%c0_1, %c128] : memref<2x512xf32, #tpu.memory_space<vmem>>, vector<2x128xf32>
    %2 = arith.addf %0, %1 : vector<2x128xf32>
    %c0_2 = arith.constant 0 : index
    %c256 = arith.constant 256 : index
    %3 = vector.load %arg1[%c0_2, %c256] : memref<2x512xf32, #tpu.memory_space<vmem>>, vector<2x128xf32>
    %4 = arith.addf %2, %3 : vector<2x128xf32>
    %c0_3 = arith.constant 0 : index
    %c384 = arith.constant 384 : index
    %5 = vector.load %arg1[%c0_3, %c384] : memref<2x512xf32, #tpu.memory_space<vmem>>, vector<2x128xf32>
    %6 = arith.addf %4, %5 : vector<2x128xf32>
    %cst = arith.constant 2.500000e-01 : f32
    %7 = vector.broadcast %cst : f32 to vector<2x128xf32>
    %8 = arith.mulf %6, %7 : vector<2x128xf32>
    %c0_4 = arith.constant 0 : index
    %c0_5 = arith.constant 0 : index
    %9 = vector.load %arg2[%c0_4, %c0_5] : memref<2x128xf32, #tpu.memory_space<vmem>>, vector<2x128xf32>
    tpu.vector_store %arg2[%c0_4, %c0_5], %8 {strides = array<i32>} : memref<2x128xf32, #tpu.memory_space<vmem>>, vector<2x128xf32>,
    return
  }
  func.func @transform_0(%arg0: i32) -> (i32, i32) {
    %c0_i32 = arith.constant 0 : i32
    %c0_i32_0 = arith.constant 0 : i32
    return %arg0, %c0_i32 : i32, i32
  }
  func.func @transform_1(%arg0: i32) -> (i32, i32) {
    %c0_i32 = arith.constant 0 : i32
    %c0_i32_0 = arith.constant 0 : i32
    return %arg0, %c0_i32 : i32, i32
  }
}

</mosaic_0001>

<bundles_post_ra>
// kernel: tpu_custom_call.1
= control target key start
LH: loop header
LB: loop body
LE: loop exit
PB: predicated region body
PF: predicated region fallthrough
CT: control target
= control target key end

     0   :  { %6 = vsyncpa [#allocation3], 0  ;;  %s131_s0 = inlined_call_operand.hbm [shape: f32[2,512], index: 0, kind: input, shape index: {}]   ;;  %s132_s1 = inlined_call_operand.hbm [shape: f32[2,128], index: 1, kind: output, shape index: {}]  }
   0x1   :  { %7 = vsyncpa [#allocation4], 0  ;;  %s95_s6 = smov [#allocation2]   ;;  %s47_s10 = scalar_lea.hbm %s131_s0, 128 }
   0x2   :  { %s14_s7 = sshll.u32 %s95_s6, 4  ;;  %p48_p0 = scmp.ne.s32.totalorder %s131_s0, %s47_s10  ;;  %s15_s7 = int_to_ptr.vmem [resolvable:$true] %s14_s7 }
   0x3   :  { %p51_p1 = scmp.lt.u32.totalorder %s47_s10, %s131_s0 }
   0x5   :  { %p53_p2 = pnand %p51_p1, %p48_p0 }
   0x7   :  { %56 = shalt.err (!%p53_p2)
}
   0x8   :  { %s57_s15 = scalar_lea.vmem %s15_s7, 128  ;;  %p62_p4 = scmp.lt.s32.totalorder %s15_s7, %s15_s7 }
   0x9   :  { %p58_p3 = scmp.ne.s32.totalorder %s15_s7, %s57_s15  ;;  %p63_p5 = scmp.lt.s32.totalorder %s57_s15, %s57_s15 }
   0xb   :  { %p64_p6 = por %p63_p5, %p62_p4 }
   0xd   :  { %p65_p7 = pnand %p64_p6, %p58_p3 }
   0xf   :  { %68 = shalt.err (!%p65_p7)
}
  0x10   :  { %17 = dma.hbm_to_vmem [thread:$0]  %s131_s0, 128, %s15_s7, [#allocation3]  }
  0x11   :  { %91 = dma.done.wait [#allocation3], 128  }
  0x12   :  { %92 = vsyncadd [#allocation3], 4294967168  ;;  %v21_v0 = vld [vmem:[#allocation2] sm:$0x3]  ;;  %v22_v1 = vld [vmem:[#allocation2 + $0x2] sm:$0x3] }
  0x13   :  { %v24_v2 = vld [vmem:[#allocation2 + $0x4] sm:$0x3]  ;;  %v23_v3 = vadd.f32 %v22_v1, %v21_v0  ;;  %v26_v4 = vld [vmem:[#allocation2 + $0x6] sm:$0x3]  ;;  %s96_s18 = smov [#allocation5]  }
  0x14   :  { %s36_s19 = sshll.u32 %s96_s18, 4  ;;  %s37_s19 = int_to_ptr.vmem [resolvable:$true] %s36_s19 }
  0x15   :  { %v25_v5 = vadd.f32 %v24_v2, %v23_v3  ;;  %s69_s20 = scalar_lea.vmem %s37_s19, 32  ;;  %p74_p9 = scmp.lt.s32.totalorder %s37_s19, %s37_s19 }
  0x16   :  { %p70_p8 = scmp.ne.s32.totalorder %s37_s19, %s69_s20  ;;  %p75_p10 = scmp.lt.s32.totalorder %s69_s20, %s69_s20 }
  0x17   :  { %v27_v6 = vadd.f32 %v26_v4, %v25_v5 }
  0x18   :  { %p76_p11 = por %p75_p10, %p74_p9 }
  0x19   :  { %v28_v7 = vmul.f32 0.25, %v27_v6 }
  0x1a   :  { %p77_p12 = pnand %p76_p11, %p70_p8 }
  0x1b   :  { %29 = vst [vmem:[#allocation5] sm:$0x3] %v28_v7 }
  0x1c   :  { %80 = shalt.err (!%p77_p12)
}
  0x1d   :  { %s81_s22 = scalar_lea.hbm %s132_s1, 32 }
  0x1e   :  { %p82_p13 = scmp.ne.s32.totalorder %s132_s1, %s81_s22  ;;  %p85_p0 = scmp.lt.u32.totalorder %s81_s22, %s132_s1 }
  0x20   :  { %p87_p1 = pnand %p85_p0, %p82_p13 }
  0x22   :  { %90 = shalt.err (!%p87_p1)
}
  0x23   :  { %39 = dma.vmem_to_hbm [thread:$0]  %s37_s19, 32, %s132_s1, [#allocation4]  }
  0x24   :  { %93 = dma.done.wait [#allocation4], 32  }
  0x25   :  { %94 = vsyncadd [#allocation4], 4294967264 }
  0x26   :  { %43 = vsyncpa [#allocation3], 1 }
  0x27   :  { %44 = vsyncpa [#allocation4], 1 }

</bundles_post_ra>
